<compile_context>
chip_gen: v5e
topology: v5e:2x2
jax: 0.10.0
libtpu: 0.0.40
codegen_flags: <defaults>
</compile_context>

<pallas_src>
import functools

import jax
import jax.numpy as jnp
from jax.experimental import pallas as pl
from jax.experimental.pallas import tpu as pltpu

LN_EPS = 1e-5


def _patch_merging_kernel(x_ref, seg_sum_ref, seg_bcast_ref, w_ref,
                          gamma_ref, beta_ref, wsum_ref, o_ref, *, inv_w2):
    """One (batch, row-block) grid step.

    x_ref:        (4C, N) f32  merged activations; N = tb*W2 lane-dense lanes.
    seg_sum_ref:  (N, TB) f32  0/1 lane->row segment-sum matrix (host-built).
    seg_bcast_ref:(TB, N) cdt  0/1 row->lane broadcast matrix (host-built).
    w_ref:        (2C, 4C) cdt 1x1-conv weight (pre-cast on host).
    gamma_ref:    (1, N)  f32  LN scale, tiled per lane (period W2).
    beta_ref:     (1, N)  f32  LN shift, tiled per lane (period W2).
    wsum_ref:     (2C, 1) f32  conv-weight row sums (beta term folded past conv).
    o_ref:        (2C, N)      lane-dense output tile.
    """
    cdt = seg_bcast_ref.dtype

    x = x_ref[...]                                   # (4C, N) f32
    seg_sum = seg_sum_ref[...]                       # (N, TB) f32
    seg_bcast = seg_bcast_ref[...]                   # (TB, N) cdt

    # ---- LayerNorm over each W2-wide row segment: two-pass, f32 stats. ----
    mean = jnp.dot(x, seg_sum, preferred_element_type=jnp.float32) * inv_w2   # (4C, TB)
    mean_l = jnp.dot(mean.astype(cdt), seg_bcast,
                     preferred_element_type=jnp.float32)                       # (4C, N)
    d = x - mean_l                                                             # centered
    var = jnp.dot(d * d, seg_sum, preferred_element_type=jnp.float32) * inv_w2
    inv_std = jax.lax.rsqrt(var + LN_EPS)                                      # (4C, TB)
    a_l = jnp.dot(inv_std.astype(cdt), seg_bcast,
                  preferred_element_type=jnp.float32)                          # (4C, N)
    z = d * a_l                                   # normalized; affine folded past conv

    # ---- 1x1 conv (no bias): one lane-dense MXU matmul, f32 accumulation. ----
    y = jnp.dot(w_ref[...], z.astype(cdt), preferred_element_type=jnp.float32)  # (2C, N)

    # ---- LN affine folded past the conv (2C rows instead of 4C). ----
    o_ref[...] = (y * gamma_ref[...] + wsum_ref[...] * beta_ref[...]).astype(o_ref.dtype)


def _round_up(v, m):
    return -(-v // m) * m


def _vmem_config():
    """(vmem_limit_bytes, per-step footprint budget) — generation aware."""
    cap = 64 * 1024 * 1024                       # conservative default (v7x per-TC)
    try:
        cap = int(pltpu.get_tpu_info().vmem_capacity_bytes)
    except Exception:
        pass
    limit = min(int(cap * 0.8), 100 * 1024 * 1024)   # leave Mosaic-scratch headroom
    budget = min(limit // 2, 32 * 1024 * 1024)       # per-step working-set target
    return limit, budget


def _choose_row_block(*, h2, w2, c4, c2, batch, in_itemsize, out_itemsize,
                      cdt_itemsize, budget_bytes):
    """Rows (W2 pixels each) merged into one lane-dense block per grid step.

    Legal tb: divides H2 and tb*W2 is 128-lane aligned (or the full H2*W2 axis).
    The budget now counts the full per-step footprint: double-buffered
    input/output slabs, the pipeline-invariant segment/affine/weight inputs,
    and the f32 intermediates live inside the body.
    """
    def footprint(tb):
        n = tb * w2
        n_pad = _round_up(n, 128)
        x_in = _round_up(c4, 8) * n_pad * in_itemsize
        out = _round_up(c2, 8) * n_pad * out_itemsize
        segs = (_round_up(n, 8) * _round_up(tb, 128) * 4            # seg_sum (f32)
                + _round_up(tb, 8) * n_pad * cdt_itemsize)          # seg_bcast (cdt)
        affine = 2 * 8 * n_pad * 4 + _round_up(c2, 8) * 128 * 4     # gamma/beta/wsum
        wmat = _round_up(c2, 8) * _round_up(c4, 128) * cdt_itemsize
        dbuf = 2 * (x_in + out + segs + affine + wmat)              # double-buffered
        interm = (5 * _round_up(c4, 8) + 2 * _round_up(c2, 8)) * n_pad * 4
        return dbuf + interm

    def legal(tb):
        return h2 % tb == 0 and ((tb * w2) % 128 == 0 or tb == h2)

    cands = [tb for tb in range(1, h2 + 1) if legal(tb)]            # ascending
    fitting = [tb for tb in cands if footprint(tb) <= budget_bytes]
    pool = fitting if fitting else cands[:1]                         # smallest legal
    tb = max(pool)
    # Keep >= 2 grid steps overall so the ("parallel","parallel") grid actually
    # shards across both v7x TensorCores even at batch == 1.
    if batch * (h2 // tb) < 2:
        halved = [t for t in pool if h2 // t >= 2]
        if halved:
            tb = max(halved)
    return tb


@functools.partial(jax.jit, static_argnames=("compute_dtype", "out_dtype"))
def patch_merging(x, gamma, beta, w_reduction, *,
                  compute_dtype=jnp.bfloat16, out_dtype=jnp.float32):
    """AS-MLP PatchMerging forward.

    x: (B, C, H, W) f32; gamma/beta: (4C,); w_reduction: (2C, 4C) or (2C, 4C, 1, 1).
    Returns (B, 2C, H//2, W//2) in out_dtype (f32 default; pass bf16 to halve the
    output HBM write traffic if the consumer accepts it).
    """
    B, C, H, W = x.shape
    assert H % 2 == 0 and W % 2 == 0, f"x size ({H}*{W}) are not even."
    H2, W2 = H // 2, W // 2
    C4, C2 = 4 * C, 2 * C
    # PyTorch's nn.LayerNorm(4*dim) applied to NCHW requires last dim == 4*dim.
    assert W2 == C4, "LayerNorm(4*dim) over NCHW requires W//2 == 4*dim (as in the reference)."

    # --- 2x2 strided de-interleave + channel concat (patch merge). Kept as a
    # host-side XLA pre-pass (lane-strided gathers have no clean in-kernel
    # equivalent); allow_input_fusion below lets XLA fuse this producer into the
    # kernel's input pipeline so the merged tensor need not round-trip HBM.
    # TODO(synk): move the de-interleave fully in-kernel once Mosaic exposes a
    # robust lane-strided load, removing the reliance on XLA input fusion.
    x0 = x[:, :, 0::2, 0::2].reshape(B, C, H2 * W2)
    x1 = x[:, :, 1::2, 0::2].reshape(B, C, H2 * W2)
    x2 = x[:, :, 0::2, 1::2].reshape(B, C, H2 * W2)
    x3 = x[:, :, 1::2, 1::2].reshape(B, C, H2 * W2)
    xk = jnp.concatenate([x0, x1, x2, x3], axis=1)          # (B, 4C, H2*W2)

    vmem_limit, vmem_budget = _vmem_config()
    cdt = jnp.dtype(compute_dtype)
    tb = _choose_row_block(h2=H2, w2=W2, c4=C4, c2=C2, batch=B,
                           in_itemsize=xk.dtype.itemsize,
                           out_itemsize=jnp.dtype(out_dtype).itemsize,
                           cdt_itemsize=cdt.itemsize,
                           budget_bytes=vmem_budget)
    n = tb * W2
    grid = (B, H2 // tb)

    # Pipeline-invariant kernel parameters, built once on the host (hoisted out
    # of the per-step body per the review).
    lane_row = jnp.arange(n, dtype=jnp.int32) // W2
    seg_sum = (lane_row[:, None] == jnp.arange(tb, dtype=jnp.int32)[None, :]
               ).astype(jnp.float32)                        # (N, TB) lane -> row sum
    seg_bcast = seg_sum.T.astype(cdt)                       # (TB, N) row -> lane bcast
    w_mat = w_reduction.reshape(w_reduction.shape[0], -1)
    assert w_mat.shape == (C2, C4)
    w_c = w_mat.astype(cdt)                                 # pre-cast conv weight
    wsum = w_mat.astype(jnp.float32).sum(axis=1, keepdims=True)      # (2C, 1)
    gamma_t = jnp.tile(gamma.astype(jnp.float32), tb).reshape(1, n)  # per-lane scale
    beta_t = jnp.tile(beta.astype(jnp.float32), tb).reshape(1, n)    # per-lane shift

    kernel = functools.partial(_patch_merging_kernel, inv_w2=1.0 / float(W2))

    params_kw = dict(
        dimension_semantics=("parallel", "parallel"),
        vmem_limit_bytes=vmem_limit,
    )
    try:   # hint: fuse the de-interleave/concat producer into the input DMA
        compiler_params = pltpu.CompilerParams(
            allow_input_fusion=[True] + [False] * 6, **params_kw)
    except TypeError:   # older jax without allow_input_fusion
        compiler_params = pltpu.CompilerParams(**params_kw)

    out_flat = pl.pallas_call(
        kernel,
        out_shape=jax.ShapeDtypeStruct((B, C2, H2 * W2), out_dtype),
        grid=grid,
        in_specs=[
            pl.BlockSpec((None, C4, n), lambda b, h: (b, 0, h)),   # activation slab
            pl.BlockSpec((n, tb), lambda b, h: (0, 0)),            # seg_sum   (invariant)
            pl.BlockSpec((tb, n), lambda b, h: (0, 0)),            # seg_bcast (invariant)
            pl.BlockSpec((C2, C4), lambda b, h: (0, 0)),           # 1x1-conv weight
            pl.BlockSpec((1, n), lambda b, h: (0, 0)),             # gamma (per lane)
            pl.BlockSpec((1, n), lambda b, h: (0, 0)),             # beta  (per lane)
            pl.BlockSpec((C2, 1), lambda b, h: (0, 0)),            # W row sums
        ],
        out_specs=pl.BlockSpec((None, C2, n), lambda b, h: (b, 0, h)),
        compiler_params=compiler_params,
    )(xk, seg_sum, seg_bcast, w_c, gamma_t, beta_t, wsum)

    # Free reshape back to NCHW: (B, 2C, H2*W2) -> (B, 2C, H2, W2). No transpose.
    return out_flat.reshape(B, C2, H2, W2)


def _reference(x, gamma, beta, w_reduction):
    """Pure-JAX reference mirroring the PyTorch forward."""
    x0 = x[:, :, 0::2, 0::2]
    x1 = x[:, :, 1::2, 0::2]
    x2 = x[:, :, 0::2, 1::2]
    x3 = x[:, :, 1::2, 1::2]
    xm = jnp.concatenate([x0, x1, x2, x3], axis=1)             # (B, 4C, H2, W2)
    mean = jnp.mean(xm, axis=-1, keepdims=True)
    var = jnp.mean((xm - mean) ** 2, axis=-1, keepdims=True)
    xn = (xm - mean) / jnp.sqrt(var + LN_EPS) * gamma + beta   # LN over last axis
    wm = w_reduction.reshape(w_reduction.shape[0], -1)
    return jnp.einsum("oc,bchw->bohw", wm, xn)                 # 1x1 conv, no bias


if __name__ == "__main__":
    # dim=2, H=W=16  ->  4*dim = 8 == W//2 (required by LayerNorm(4*dim) on NCHW).
    B, dim, H, W = 2, 2, 16, 16
    key = jax.random.PRNGKey(0)
    k_x, k_g, k_b, k_w = jax.random.split(key, 4)

    x = jax.random.normal(k_x, (B, dim, H, W), dtype=jnp.float32)
    gamma = 1.0 + 0.1 * jax.random.normal(k_g, (4 * dim,), dtype=jnp.float32)
    beta = 0.1 * jax.random.normal(k_b, (4 * dim,), dtype=jnp.float32)
    w_reduction = (jax.random.normal(k_w, (2 * dim, 4 * dim), dtype=jnp.float32)
                   / jnp.sqrt(4.0 * dim))

    ref = _reference(x, gamma, beta, w_reduction)

    # Exact mode: f32 MXU operands (tight correctness check).
    out_f32 = jax.block_until_ready(
        patch_merging(x, gamma, beta, w_reduction, compute_dtype=jnp.float32))
    assert out_f32.shape == (B, 2 * dim, H // 2, W // 2), out_f32.shape
    assert jnp.allclose(out_f32, ref, atol=1e-4, rtol=1e-4), \
        float(jnp.max(jnp.abs(out_f32 - ref)))

    # Default mode: bf16 MXU operands, f32 accumulation / f32 LN stats.
    # (Loose bound: bf16 operand rounding gives ~1e-2 typical error here.)
    out = jax.block_until_ready(patch_merging(x, gamma, beta, w_reduction))
    assert out.shape == (B, 2 * dim, H // 2, W // 2), out.shape
    assert jnp.allclose(out, ref, atol=1e-1, rtol=1e-1), \
        float(jnp.max(jnp.abs(out - ref)))

    print("KERNEL_OK")
</pallas_src>

<mosaic_0001>
module attributes {stable_mosaic.version = 11 : i64} {
  func.func @_patch_merging_kernel(%arg0: i32, %arg1: i32, %arg2: memref<1x8x64xf32, #tpu.memory_space<vmem>>, %arg3: memref<64x8xf32, #tpu.memory_space<vmem>>, %arg4: memref<8x64xf32, #tpu.memory_space<vmem>>, %arg5: memref<4x8xf32, #tpu.memory_space<vmem>>, %arg6: memref<1x64xf32, #tpu.memory_space<vmem>>, %arg7: memref<1x64xf32, #tpu.memory_space<vmem>>, %arg8: memref<4x1xf32, #tpu.memory_space<vmem>>, %arg9: memref<1x4x64xf32, #tpu.memory_space<vmem>>) attributes {dimension_semantics = [#tpu.dimension_semantics<parallel>, #tpu.dimension_semantics<parallel>], iteration_bounds = array<i64: 2, 1>, scalar_prefetch = 0 : i64, scratch_operands = 0 : i64, tpu.core_type = #tpu.core_type<tc>, window_params = [{transform_indices = @transform_0, window_bounds = array<i64: 1, 8, 64>}, {pipeline_mode = #tpu.pipeline_mode<synchronous>, transform_indices = @transform_1, window_bounds = array<i64: 64, 8>}, {pipeline_mode = #tpu.pipeline_mode<synchronous>, transform_indices = @transform_2, window_bounds = array<i64: 8, 64>}, {pipeline_mode = #tpu.pipeline_mode<synchronous>, transform_indices = @transform_3, window_bounds = array<i64: 4, 8>}, {pipeline_mode = #tpu.pipeline_mode<synchronous>, transform_indices = @transform_4, window_bounds = array<i64: 1, 64>}, {pipeline_mode = #tpu.pipeline_mode<synchronous>, transform_indices = @transform_5, window_bounds = array<i64: 1, 64>}, {pipeline_mode = #tpu.pipeline_mode<synchronous>, transform_indices = @transform_6, window_bounds = array<i64: 4, 1>}, {transform_indices = @transform_7, window_bounds = array<i64: 1, 4, 64>}]} {
    %c0 = arith.constant 0 : index
    %c0_0 = arith.constant 0 : index
    %c0_1 = arith.constant 0 : index
    %0 = vector.load %arg2[%c0, %c0_0, %c0_1] : memref<1x8x64xf32, #tpu.memory_space<vmem>>, vector<1x8x64xf32>
    %1 = vector.shape_cast %0 : vector<1x8x64xf32> to vector<8x64xf32>
    %c0_2 = arith.constant 0 : index
    %c0_3 = arith.constant 0 : index
    %2 = vector.load %arg3[%c0_2, %c0_3] : memref<64x8xf32, #tpu.memory_space<vmem>>, vector<64x8xf32>
    %c0_4 = arith.constant 0 : index
    %c0_5 = arith.constant 0 : index
    %3 = vector.load %arg4[%c0_4, %c0_5] : memref<8x64xf32, #tpu.memory_space<vmem>>, vector<8x64xf32>
    %cst = arith.constant dense<0.000000e+00> : vector<8x8xf32>
    %4 = tpu.matmul %1, %2, %cst {dimension_numbers = #tpu.dot_dimension_numbers<[1], [0], [0], [1], [0, 0, 1, 1], [], []>} : vector<8x64xf32>, vector<64x8xf32>, vector<8x8xf32> -> vector<8x8xf32>
    %cst_6 = arith.constant 1.250000e-01 : f32
    %5 = vector.broadcast %cst_6 : f32 to vector<8x8xf32>
    %6 = arith.mulf %4, %5 : vector<8x8xf32>
    %cst_7 = arith.constant dense<0.000000e+00> : vector<8x64xf32>
    %7 = tpu.matmul %6, %3, %cst_7 {dimension_numbers = #tpu.dot_dimension_numbers<[1], [0], [0], [1], [0, 0, 1, 1], [], []>} : vector<8x8xf32>, vector<8x64xf32>, vector<8x64xf32> -> vector<8x64xf32>
    %8 = arith.subf %1, %7 : vector<8x64xf32>
    %9 = arith.mulf %8, %8 : vector<8x64xf32>
    %cst_8 = arith.constant dense<0.000000e+00> : vector<8x8xf32>
    %10 = tpu.matmul %9, %2, %cst_8 {dimension_numbers = #tpu.dot_dimension_numbers<[1], [0], [0], [1], [0, 0, 1, 1], [], []>} : vector<8x64xf32>, vector<64x8xf32>, vector<8x8xf32> -> vector<8x8xf32>
    %cst_9 = arith.constant 1.250000e-01 : f32
    %11 = vector.broadcast %cst_9 : f32 to vector<8x8xf32>
    %12 = arith.mulf %10, %11 : vector<8x8xf32>
    %cst_10 = arith.constant 9.99999974E-6 : f32
    %13 = vector.broadcast %cst_10 : f32 to vector<8x8xf32>
    %14 = arith.addf %12, %13 : vector<8x8xf32>
    %15 = math.rsqrt %14 : vector<8x8xf32>
    %cst_11 = arith.constant dense<0.000000e+00> : vector<8x64xf32>
    %16 = tpu.matmul %15, %3, %cst_11 {dimension_numbers = #tpu.dot_dimension_numbers<[1], [0], [0], [1], [0, 0, 1, 1], [], []>} : vector<8x8xf32>, vector<8x64xf32>, vector<8x64xf32> -> vector<8x64xf32>
    %17 = arith.mulf %8, %16 : vector<8x64xf32>
    %c0_12 = arith.constant 0 : index
    %c0_13 = arith.constant 0 : index
    %18 = vector.load %arg5[%c0_12, %c0_13] : memref<4x8xf32, #tpu.memory_space<vmem>>, vector<4x8xf32>
    %cst_14 = arith.constant dense<0.000000e+00> : vector<4x64xf32>
    %19 = tpu.matmul %18, %17, %cst_14 {dimension_numbers = #tpu.dot_dimension_numbers<[1], [0], [0], [1], [0, 0, 1, 1], [], []>} : vector<4x8xf32>, vector<8x64xf32>, vector<4x64xf32> -> vector<4x64xf32>
    %c0_15 = arith.constant 0 : index
    %c0_16 = arith.constant 0 : index
    %20 = vector.load %arg6[%c0_15, %c0_16] : memref<1x64xf32, #tpu.memory_space<vmem>>, vector<1x64xf32>
    %21 = vector.broadcast %20 : vector<1x64xf32> to vector<4x64xf32>
    %22 = arith.mulf %19, %21 : vector<4x64xf32>
    %c0_17 = arith.constant 0 : index
    %c0_18 = arith.constant 0 : index
    %23 = vector.load %arg8[%c0_17, %c0_18] : memref<4x1xf32, #tpu.memory_space<vmem>>, vector<4x1xf32>
    %c0_19 = arith.constant 0 : index
    %c0_20 = arith.constant 0 : index
    %24 = vector.load %arg7[%c0_19, %c0_20] : memref<1x64xf32, #tpu.memory_space<vmem>>, vector<1x64xf32>
    %25 = vector.broadcast %23 : vector<4x1xf32> to vector<4x64xf32>
    %26 = vector.broadcast %24 : vector<1x64xf32> to vector<4x64xf32>
    %27 = arith.mulf %25, %26 : vector<4x64xf32>
    %28 = arith.addf %22, %27 : vector<4x64xf32>
    %c0_21 = arith.constant 0 : index
    %c0_22 = arith.constant 0 : index
    %c0_23 = arith.constant 0 : index
    %29 = vector.load %arg9[%c0_21, %c0_22, %c0_23] : memref<1x4x64xf32, #tpu.memory_space<vmem>>, vector<1x4x64xf32>
    %30 = vector.shape_cast %29 : vector<1x4x64xf32> to vector<4x64xf32>
    %31 = vector.shape_cast %28 : vector<4x64xf32> to vector<1x4x64xf32>
    tpu.vector_store %arg9[%c0_21, %c0_22, %c0_23], %31 {strides = array<i32>} : memref<1x4x64xf32, #tpu.memory_space<vmem>>, vector<1x4x64xf32>,
    return
  }
  func.func @transform_0(%arg0: i32, %arg1: i32) -> (i32, i32, i32) {
    %c0_i32 = arith.constant 0 : i32
    %c0_i32_0 = arith.constant 0 : i32
    return %arg0, %c0_i32, %arg1 : i32, i32, i32
  }
  func.func @transform_1(%arg0: i32, %arg1: i32) -> (i32, i32) {
    %c0_i32 = arith.constant 0 : i32
    %c0_i32_0 = arith.constant 0 : i32
    %c0_i32_1 = arith.constant 0 : i32
    return %c0_i32, %c0_i32_0 : i32, i32
  }
  func.func @transform_2(%arg0: i32, %arg1: i32) -> (i32, i32) {
    %c0_i32 = arith.constant 0 : i32
    %c0_i32_0 = arith.constant 0 : i32
    %c0_i32_1 = arith.constant 0 : i32
    return %c0_i32, %c0_i32_0 : i32, i32
  }
  func.func @transform_3(%arg0: i32, %arg1: i32) -> (i32, i32) {
    %c0_i32 = arith.constant 0 : i32
    %c0_i32_0 = arith.constant 0 : i32
    %c0_i32_1 = arith.constant 0 : i32
    return %c0_i32, %c0_i32_0 : i32, i32
  }
  func.func @transform_4(%arg0: i32, %arg1: i32) -> (i32, i32) {
    %c0_i32 = arith.constant 0 : i32
    %c0_i32_0 = arith.constant 0 : i32
    %c0_i32_1 = arith.constant 0 : i32
    return %c0_i32, %c0_i32_0 : i32, i32
  }
  func.func @transform_5(%arg0: i32, %arg1: i32) -> (i32, i32) {
    %c0_i32 = arith.constant 0 : i32
    %c0_i32_0 = arith.constant 0 : i32
    %c0_i32_1 = arith.constant 0 : i32
    return %c0_i32, %c0_i32_0 : i32, i32
  }
  func.func @transform_6(%arg0: i32, %arg1: i32) -> (i32, i32) {
    %c0_i32 = arith.constant 0 : i32
    %c0_i32_0 = arith.constant 0 : i32
    %c0_i32_1 = arith.constant 0 : i32
    return %c0_i32, %c0_i32_0 : i32, i32
  }
  func.func @transform_7(%arg0: i32, %arg1: i32) -> (i32, i32, i32) {
    %c0_i32 = arith.constant 0 : i32
    %c0_i32_0 = arith.constant 0 : i32
    return %arg0, %c0_i32, %arg1 : i32, i32, i32
  }
}

</mosaic_0001>

<bundles_post_ra>
// kernel: tile.13
= control target key start
LH: loop header
LB: loop body
LE: loop exit
PB: predicated region body
PF: predicated region fallthrough
CT: control target
= control target key end

     0   :  { %s22_s0 = inlined_call_operand.vmem [shape: f32[8], index: 0, kind: input, shape index: {}]   ;;  %s23_s1 = inlined_call_operand.vmem [shape: f32[8,8], index: 1, kind: output, shape index: {}]  }
   0x1   :  { %v4_v0 = vld [vmem:[%s22_s0] ss:$0 sm:$0xff] }
   0x2   :  { %5 = vst [vmem:[%s23_s1] sm:$0xff] %v4_v0 }

// kernel: tile.14
= control target key start
LH: loop header
LB: loop body
LE: loop exit
PB: predicated region body
PF: predicated region fallthrough
CT: control target
= control target key end

     0   :  { %s67_s10 = smov 56   ;;  %s68_s11 = smov 40   ;;  %vm3_vm0 = vcmask 64512   ;;  %vm9_vm1 = vcmask 523712   ;;  %vm15_vm2 = vcmask 458112   ;;  %vm21_vm3 = vcmask 392512   ;;  %s111_s0 = inlined_call_operand.vmem [shape: f32[8,8], index: 0, kind: input, shape index: {}]   ;;  %s112_s1 = inlined_call_operand.vmem [shape: f32[1,64], index: 1, kind: output, shape index: {}]  }
   0x1   :  { %v53_v0 = vld [vmem:[%s111_s0 + $0x7] sm:$0x1]   ;;  %v55_v1 = vld [vmem:[%s111_s0 + $0x5] sm:$0x1]   ;;  %v57_v2 = vld [vmem:[%s111_s0 + $0x3] sm:$0x1]  }
   0x2   :  { %7 = vrot.lane.b32.xlu0 %v53_v0, %s67_s10  ;;  %19 = vrot.lane.b32.xlu1 %v55_v1, %s68_s11  ;;  %s69_s14 = smov 24   ;;  %v54_v3 = vld [vmem:[%s111_s0 + $0x6] sm:$0x1]   ;;  %v56_v4 = vld [vmem:[%s111_s0 + $0x4] sm:$0x1]   ;;  %s70_s21 = smov 48  }
   0x3   :  { %31 = vrot.lane.b32.xlu2 %v57_v2, %s69_s14  ;;  %v58_v5 = vld [vmem:[%s111_s0 + $0x2] sm:$0x1]   ;;  %s71_s22 = smov 32   ;;  %s72_s23 = smov 16   ;;  %v59_v6 = vld [vmem:[%s111_s0 + $0x1] sm:$0x1]  }
   0x4   :  { %s73_s26 = smov 8   ;;  %v2_v7 = vld [vmem:[%s111_s0] sm:$0x1]   ;;  %vm27_vm4 = vcmask 326912   ;;  %vm33_vm5 = vcmask 261312   ;;  %vm39_vm6 = vcmask 195712  }
   0x5   :  { %4 = vst.msk [vmem:[#allocation0] sm:$0x1] %vm3_vm0, %v2_v7   ;;  %vm45_vm7 = vcmask 130112  }
   0xa   :  { %13 = vrot.lane.b32.xlu0 %v54_v3, %s70_s21  ;;  %25 = vrot.lane.b32.xlu1 %v56_v4, %s71_s22 }
   0xb   :  { %37 = vrot.lane.b32.xlu2 %v58_v5, %s72_s23 }
  0x12   :  { %43 = vrot.lane.b32.xlu0 %v59_v6, %s73_s26 }
  0x5d   :  { %v32_v8 = vpop.permute.xlu2 %31  }
  0x65   :  { %v38_v9 = vpop.permute.xlu2 %37  }
  0x74   :  { %v8_v10 = vpop.permute.xlu0 %7   ;;  %v20_v11 = vpop.permute.xlu1 %19  }
  0x75   :  { %10 = vst.msk [vmem:[#allocation0] sm:$0x1] %vm9_vm1, %v8_v10  }
  0x7c   :  { %v14_v12 = vpop.permute.xlu0 %13   ;;  %v26_v13 = vpop.permute.xlu1 %25  }
  0x7d   :  { %16 = vst.msk [vmem:[#allocation0] sm:$0x1] %vm15_vm2, %v14_v12  }
  0x7e   :  { %22 = vst.msk [vmem:[#allocation0] sm:$0x1] %vm21_vm3, %v20_v11  }
  0x7f   :  { %28 = vst.msk [vmem:[#allocation0] sm:$0x1] %vm27_vm4, %v26_v13  }
  0x80   :  { %34 = vst.msk [vmem:[#allocation0] sm:$0x1] %vm33_vm5, %v32_v8  }
  0x81   :  { %40 = vst.msk [vmem:[#allocation0] sm:$0x1] %vm39_vm6, %v38_v9  }
  0x84   :  { %v44_v14 = vpop.permute.xlu0 %43  }
  0x85   :  { %46 = vst.msk [vmem:[#allocation0] sm:$0x1] %vm45_vm7, %v44_v14  }
  0x8c   :  { %v49_v15 = vld [vmem:[#allocation0] sm:$0x1] }
  0x8d   :  { %52 = vst [vmem:[%s112_s1] sm:$0x1] %v49_v15 }

// kernel: patch_merging.2
= control target key start
LH: loop header
LB: loop body
LE: loop exit
PB: predicated region body
PF: predicated region fallthrough
CT: control target
= control target key end

     0   :  { %s1078_s19 = smov 0   ;;  %s1080_s20 = smov 0   ;;  %s1183_s0 = inlined_call_operand.vmem [shape: f32[64,8], index: 0, kind: input, shape index: {}]   ;;  %s1184_s1 = inlined_call_operand.vmem [shape: f32[8,64], index: 1, kind: input, shape index: {}]   ;;  %s1185_s2 = inlined_call_operand.vmem [shape: f32[4,8], index: 2, kind: input, shape index: {}]   ;;  %s1186_s3 = inlined_call_operand.vmem [shape: f32[1,64], index: 3, kind: input, shape index: {}]   ;;  %s1187_s4 = inlined_call_operand.vmem [shape: f32[1,64], index: 4, kind: input, shape index: {}]   ;;  %s1188_s5 = inlined_call_operand.vmem [shape: f32[4,1], index: 5, kind: input, shape index: {}]   ;;  %s1189_s6 = inlined_call_operand.vmem [shape: f32[2,2,64], index: 6, kind: input, shape index: {}]   ;;  %s1190_s7 = inlined_call_operand.<no memory space> [shape: f32[], index: 7, kind: input, shape index: {}]   ;;  %s1191_s8 = inlined_call_operand.vmem [shape: f32[2,2,64], index: 8, kind: input, shape index: {}]   ;;  %s1192_s9 = inlined_call_operand.vmem [shape: f32[2,2,64], index: 9, kind: input, shape index: {}]   ;;  %s1193_s10 = inlined_call_operand.vmem [shape: f32[2,2,64], index: 10, kind: input, shape index: {}]   ;;  %s1194_s11 = inlined_call_operand.vmem [shape: f32[2,4,64], index: 11, kind: output, shape index: {}]  }
   0x1   :  { %v1076_v0 = vstv %s1190_s7  ;;  %s1082_s21 = smov 0  }
   0x2 LB: > { %s37_s7 = sadd.s32 1, %s1006_s20  ;;  %p945_p0 = scmp.ge.s32.totalorder %s1010_s21, 1  ;;  %s1010_s21 = sphi %s1082_s21, %s25_s21   ;;  %s1006_s20 = sphi %s1080_s20, %s1196_s20   ;;  %s1002_s19 = sphi %s1078_s19, %s1195_s19  }
   0x3   : > { %p39_p1 = scmp.ge.s32.totalorder %s37_s7, 2  ;;  %p416_p2 = scmp.lt.s32.totalorder %s1010_s21, 3 }
   0x5   : > { %s1198_s7 = smov (%p39_p1, %s37_s7), 0  ;;  %p417_p3 = pnand %p945_p0, %p416_p2 }
   0x6   : > { %p500_p4 = scmp.lt.s32.totalorder (!%p417_p3), %s1002_s19, 1 }
   0x7   : > { %420 = sbr.rel (%p417_p3) target bundleno = 708 (0x2c4), region = 60 }
   0xc   : > { %v658_v1 = vld [vmem:[%s1183_s0 + $0x38] sm:$0xff]  ;;  %v657_v2 = vld [vmem:[%s1183_s0 + $0x30] sm:$0xff]  ;;  %v565_v3 = vlaneseq  ;;  %v656_v4 = vld [vmem:[%s1183_s0 + $0x28] sm:$0xff]  ;;  %s1200_s19 = smov (!%p500_p4, %s1002_s19), 1  ;;  %vm598_vm0 = vcmask 1043456   ;;  %vm577_vm4 = vcmask 1041408  }
   0xd   : > { %672 = vmatpush.msra.mxu0 %v658_v1  ;;  %722 = vmatpush.msra.mxu2 %v658_v1  ;;  %v655_v7 = vld [vmem:[%s1183_s0 + $0x20] sm:$0xff]  ;;  %s946_s30 = sshll.u32 %s1200_s19, 1  ;;  %v654_v9 = vld [vmem:[%s1183_s0 + $0x18] sm:$0xff]  ;;  %vm619_vm5 = vcmask 1045504   ;;  %v653_v16 = vld [vmem:[%s1183_s0 + $0x10] sm:$0xff]  ;;  %vm660_vm6 = vcmask 523264  }
   0xe   : > { %v566_v5 = vshrl.u32 %v565_v3, 7  ;;  %v572_v6 = vand.u32 127, %v565_v3  ;;  %s509_s16 = scalar_lea.vmem %s1189_s6, %s946_s30  ;;  %s525_s22 = scalar_lea.vmem %s1191_s8, %s946_s30  ;;  %v652_v23 = vld [vmem:[%s1183_s0 + $0x8] sm:$0xff]  ;;  %v651_v29 = vld [vmem:[%s1183_s0] sm:$0xff]  ;;  %vm685_vm7 = vcmask 64512   ;;  %v1012_v51 = vmov 0  }
   0xf   : > { %673 = vmatpush.msra.mxu0 %v657_v2  ;;  %723 = vmatpush.msra.mxu2 %v657_v2  ;;  %s541_s25 = scalar_lea.vmem %s1192_s9, %s946_s30  ;;  %s551_s28 = scalar_lea.vmem %s1193_s10, %s946_s30  ;;  %v564_v10 = vld [vmem:[%s509_s16] sm:$0x3]  ;;  %vm811_vm11 = vcmask 519168  }
  0x10   : > { %v567_v8 = vadd.s32 8, %v566_v5  ;;  %vm626_vm1 = vcmp.lt.s32.totalorder %v566_v5, 2  ;;  %vm575_vm3 = vcmp.lt.s32.totalorder %v572_v6, 64  ;;  %v585_v11 = vld [vmem:[%s525_s22] sm:$0x3]  ;;  %983 = vset.pattern.permute.xlu0 %v1012_v51  ;;  %s950_s29 = sshll.u32 %s1200_s19, 2 }
  0x11   : > { %674 = vmatpush.msra.mxu0 %v656_v4  ;;  %724 = vmatpush.msra.mxu2 %v656_v4  ;;  %v606_v14 = vld [vmem:[%s541_s25] sm:$0x3]  ;;  %s558_s13 = scalar_lea.vmem %s1194_s11, %s950_s29 }
  0x12   : > { %vm568_vm2 = vcmp.lt.s32.totalorder %v567_v8, 10  ;;  %v622_v15 = vld [vmem:[%s551_s28] sm:$0x3] }
  0x13   : > { %675 = vmatpush.msra.mxu0 %v655_v7  ;;  %v569_v12 = vsel %vm568_vm2, %v564_v10, %v1076_v0  ;;  %v590_v13 = vsel %vm568_vm2, %v585_v11, %v1076_v0  ;;  %725 = vmatpush.msra.mxu2 %v655_v7  ;;  %v611_v19 = vsel %vm568_vm2, %v606_v14, %v1076_v0  ;;  %v659_v34 = vld [vmem:[%s1184_s1] sm:$0xff] }
  0x14   : > { %v576_v17 = vsel %vm575_vm3, %v569_v12, %v1076_v0  ;;  %v597_v18 = vsel %vm575_vm3, %v590_v13, %v1076_v0  ;;  %v627_v20 = vsel %vm626_vm1, %v622_v15, %v1076_v0  ;;  %v618_v22 = vsel %vm575_vm3, %v611_v19, %v1076_v0  ;;  %704 = vmatpush.msra.mxu1 %v659_v34  ;;  %v799_v50 = vld [vmem:[%s1188_s5] sm:$0xf] }
  0x15   : > { %676 = vmatpush.msra.mxu0 %v654_v9  ;;  %v599_v21 = vsel %vm598_vm0, %v597_v18, %v1076_v0  ;;  %v578_v24 = vsel %vm577_vm4, %v576_v17, %v1076_v0  ;;  %v620_v25 = vsel %vm619_vm5, %v618_v22, %v1076_v0  ;;  %v634_v26 = vsel %vm575_vm3, %v627_v20, %v1076_v0  ;;  %v770_v54 = vld [vmem:[%s1185_s2] sm:$0xf] }
  0x16   : > { %726 = vmatpush.msra.mxu2 %v654_v9  ;;  %v600_v27 = vrot.slane %v599_v21, 4  ;;  %v621_v28 = vrot.slane %v620_v25, 6  ;;  %v579_v30 = vrot.slane %v578_v24, 2  ;;  %764 = vmatpush.msra.mxu3 %v659_v34  ;;  %v984_v55 = vld [vmem:[%s1187_s4] ss:$0 sm:$0xff] }
  0x17   : > { %677 = vmatpush.msra.mxu0 %v653_v16  ;;  %803 = vperm.xlu0 %983, %v799_v50   ;;  %v985_v57 = vld [vmem:[%s1186_s3] ss:$0 sm:$0xff] }
  0x18   : > { %727 = vmatpush.msra.mxu2 %v653_v16  ;;  %v637_v31 = vmax.f32 %v634_v26, %v621_v28 }
  0x19   : > { %678 = vmatpush.msra.mxu0 %v652_v23 }
  0x1a   : > { %728 = vmatpush.msra.mxu2 %v652_v23  ;;  %v641_v32 = vmax.f32 %v637_v31, %v600_v27 }
  0x1b   : > { %679 = vmatpush.msra.mxu0 %v651_v29 }
  0x1c   : > { %729 = vmatpush.msra.mxu2 %v651_v29  ;;  %v645_v33 = vmax.f32 %v641_v32, %v579_v30 }
  0x1e   : > { %951 = vmatmul.msk.f32.vlgmr.msra.gmra.mxu0 %vm660_vm6, %v645_v33 }
  0x89   : > { %v804_v56 = vpop.permute.xlu0 %803 }
  0x8a   : > { %v809_v58 = vmul.f32 %v984_v55, %v804_v56 }
  0x9b   : > { %v681_v35 = vpop.f32.mrf.mxu0 }
  0x9c   : > { %v684_v36 = vmul.f32 0.125, %v681_v35 }
  0x9e   : > { %952 = vmatmul.msk.f32.vlgmr.msra.gmra.mxu1 %vm685_vm7, %v684_v36 }
 0x11b   : > { %v706_v37 = vpop.f32.mrf.mxu1 }
 0x11c   : > { %v709_v38 = vsub.f32 %v645_v33, %v706_v37 }
 0x11e   : > { %v710_v39 = vmul.f32 %v709_v38, %v709_v38 }
 0x120   : > { %953 = vmatmul.msk.f32.vlgmr.msra.gmra.mxu2 %vm660_vm6, %v710_v39 }
 0x1a3   : > { %v731_v40 = vpop.f32.mrf.mxu2 }
 0x1a4   : > { %v734_v41 = vmul.f32 0.125, %v731_v40 }
 0x1a6   : > { %v735_v42 = vadd.f32 1e-05, %v734_v41 }
 0x1a8   : > { %986 = vrsqrt.f32 %v735_v42  ;;  %vm742_vm9 = vweird.f32 %v735_v42 }
 0x1ae   : > { %v987_v43 = vpop.eup %986 }
 0x1af   : > { %v737_v44 = vmul.f32 %v987_v43, %v735_v42  ;;  %vm743_vm8 = vweird.f32 %v987_v43 }
 0x1b0   : > { %vm744_vm10 = vmor %vm742_vm9, %vm743_vm8 }
 0x1b1   : > { %v738_v45 = vmul.f32 %v987_v43, %v737_v44 }
 0x1b3   : > { %v739_v46 = vmul.f32 0.5, %v738_v45 }
 0x1b5   : > { %v740_v47 = vsub.f32 1.5, %v739_v46 }
 0x1b7   : > { %v741_v48 = vmul.f32 %v987_v43, %v740_v47 }
 0x1b9   : > { %v745_v49 = vsel %vm744_vm10, %v987_v43, %v741_v48 }
 0x1ba   : > { %954 = vmatmul.msk.f32.vlgmr.msra.gmra.mxu3 %vm685_vm7, %v745_v49 }
 0x23d   : > { %v766_v52 = vpop.f32.mrf.mxu3 }
 0x23e   : > { %v769_v53 = vmul.f32 %v766_v52, %v709_v38 }
 0x240   : > { %789 = vmatpush.msrb.mxu1 %v769_v53 }
 0x241   : > { %955 = vmatmul.msk.f32.vlgmr.msrb.gmra.mxu1 %vm685_vm7, %v770_v54 }
 0x2be   : > { %v791_v59 = vpop.f32.mrf.mxu1 }
 0x2bf   : > { %v798_v60 = vmul.f32 %v985_v57, %v791_v59 }
 0x2c1   : > { %v810_v61 = vadd.f32 %v809_v58, %v798_v60 }
 0x2c3   : > { %812 = vst.msk [vmem:[%s558_s13] sm:$0xf] %vm811_vm11, %v810_v61 }
 0x2c4 PF: > { %s25_s21 = sadd.s32 1, %s1010_s21   ;;  %s1195_s19 = smov %s1006_s20 }
 0x2c5   : > { %p22_p5 = scmp.ge.s32.totalorder %s25_s21, 4   ;;  %s1196_s20 = smov %s1198_s7 }
 0x2c7   :  { %24 = sbr.rel (!%p22_p5) target bundleno = 2 (0x2), region = 99 }

</bundles_post_ra>
